<compile_context>
chip_gen: v7x
topology: tpu7x:2x2x1
jax: 0.10.0
libtpu: 0.0.40
codegen_flags: <defaults>
</compile_context>

<pallas_src>
import functools

import jax
import jax.numpy as jnp
import numpy as np
from jax import lax
from jax.experimental import pallas as pl
from jax.experimental.pallas import tpu as pltpu

EPS = 1e-5
# kh -> input-row offset: output row oh = 2*ih + kh - 1, so for oh = 2p + a the
# contributing input row is ih = p + _SHIFT[kh] (same relation for columns).
_SHIFT = {0: 1, 1: 0, 2: 0, 3: -1}
# output phase a = oh % 2 selects which kernel rows contribute (same for cols).
_TAPS = {0: (1, 3), 1: (0, 2)}
# 9 distinct (dh, dw) input shifts; slot s = (dh+1)*3 + (dw+1).
_DELTAS = tuple((dh, dw) for dh in (-1, 0, 1) for dw in (-1, 0, 1))


def _unet_up_kernel(x_ref, w_ref, o_ref, *, h, w, co_t):
    """One (batch, C_out-tile) grid point.

    x_ref: (C_in, H*W)        bf16, lane-dense input for this batch element
    w_ref: (4*CO_T, 9*C_in)   bf16, phase-major 9-tap packed weights
    o_ref: (4*CO_T, H*W)      bf16, phase-major output (phase = 2*(oh%2)+(ow%2))
    """
    hw = h * w

    # Halo rebuild: rolls done on an f32 copy (32-bit lane rotate); matmul
    # operands stay bf16.
    xf = x_ref[...].astype(jnp.float32)                      # (C_in, HW)

    lane = lax.broadcasted_iota(jnp.int32, (1, hw), 1)
    if (w & (w - 1)) == 0:                                   # power-of-two W
        col = lane & (w - 1)
    else:
        col = lane % w

    slices = []
    for dh, dw in _DELTAS:
        delta = dh * w + dw
        if delta == 0:
            v = xf
        else:
            v = pltpu.roll(xf, shift=(-delta) % hw, axis=1)  # v[i] = xf[i + delta]
        m = None
        if dh == 1:
            m = lane < (h - 1) * w                           # row p < H-1
        elif dh == -1:
            m = lane >= w                                    # row p >= 1
        if dw == 1:
            cm = col < (w - 1)
            m = cm if m is None else (m & cm)
        elif dw == -1:
            cm = col >= 1
            m = cm if m is None else (m & cm)
        if m is not None:
            v = jnp.where(m, v, 0.0)
        slices.append(v.astype(jnp.bfloat16))
    xs9 = jnp.concatenate(slices, axis=0)                    # (9*C_in, HW) bf16

    # One MXU matmul covering all 4 phases of this C_out tile.
    acc = jnp.dot(w_ref[...], xs9,
                  preferred_element_type=jnp.float32)        # (4*CO_T, HW) f32

    # InstanceNorm2d(affine=False): per-channel stats over all 4 phases * HW.
    s1 = acc.sum(axis=1, keepdims=True)                      # (4*CO_T, 1)
    s2 = (acc * acc).sum(axis=1, keepdims=True)
    s1 = s1[0:co_t] + s1[co_t:2 * co_t] + s1[2 * co_t:3 * co_t] + s1[3 * co_t:4 * co_t]
    s2 = s2[0:co_t] + s2[co_t:2 * co_t] + s2[2 * co_t:3 * co_t] + s2[3 * co_t:4 * co_t]
    inv_n = 1.0 / (4.0 * hw)
    mean = s1 * inv_n                                        # (CO_T, 1)
    # TODO(synk): E[x^2]-mean^2 in f32 can cancel for very large activations; a
    # centered second pass over acc would be safer in that regime.
    var = jnp.maximum(s2 * inv_n - mean * mean, 0.0)
    inv = lax.rsqrt(var + EPS)
    mean4 = jnp.concatenate([mean, mean, mean, mean], axis=0)  # (4*CO_T, 1)
    inv4 = jnp.concatenate([inv, inv, inv, inv], axis=0)

    y = jnp.maximum((acc - mean4) * inv4, 0.0)
    o_ref[...] = y.astype(o_ref.dtype)


def _tile_bytes(shape, itemsize):
    """VMEM footprint of a block after (8,128) padding of the two minor dims."""
    s = list(shape)
    s[-1] = -(-s[-1] // 128) * 128
    if len(s) >= 2:
        s[-2] = -(-s[-2] // 8) * 8
    b = itemsize
    for d in s:
        b *= d
    return b


def unet_up_forward(x, weight, skip):
    """UNetUp forward: ConvTranspose2d(4,2,1,bias=False)+InstanceNorm+ReLU, concat skip.

    x:      (N, C_in, H, W)
    weight: (C_in, C_out, 4, 4)   PyTorch ConvTranspose2d layout
    skip:   (N, C_skip, 2H, 2W)
    returns (N, C_out + C_skip, 2H, 2W)  bf16
    """
    n, c_in, h, w = x.shape
    c_out = weight.shape[1]
    hw = h * w

    try:
        phys_vmem = int(pltpu.get_tpu_info().vmem_capacity_bytes)
    except Exception:
        phys_vmem = 64 << 20   # conservative (v7x) fallback

    def est_bytes(co_t):
        # double-buffered pipeline blocks + single-buffered in-kernel temporaries
        blocks = (_tile_bytes((c_in, hw), 2)                 # x tile (bf16)
                  + _tile_bytes((4 * co_t, 9 * c_in), 2)     # packed weights
                  + _tile_bytes((4 * co_t, hw), 2))          # bf16 output tile
        temps = (_tile_bytes((c_in, hw), 4)                  # f32 copy for rolls
                 + 2 * 9 * _tile_bytes((c_in, hw), 2)        # shifted slices + xs9
                 + _tile_bytes((4 * co_t, hw), 4)            # f32 accumulator
                 + _tile_bytes((4 * co_t, hw), 2))           # bf16 store temp
        return 2 * blocks + temps

    # Per-channel IN stats -> the C_out axis needs no cross-tile reduction and can
    # be tiled freely; pick the largest tile that fits the VMEM budget.
    tile_budget = min(40 << 20, phys_vmem // 2)
    co_tile = c_out
    for t in (256, 128, 64, 32, 16, 8):
        if c_out % t == 0 and est_bytes(t) <= tile_budget:
            co_tile = t
            break
    n_co = c_out // co_tile
    # Guarantee >=2 grid steps so 2-TensorCore chips (v7x) can split the work.
    if n * n_co == 1 and co_tile % 2 == 0:
        co_tile //= 2
        n_co = 2

    vmem_limit = int(min(max(est_bytes(co_tile) + (4 << 20), 32 << 20),
                         min(phys_vmem, 100 << 20)))

    # Inputs: lane-dense (C_in, HW) bf16 -- no halo padding pass in HBM.
    x2 = x.astype(jnp.bfloat16).reshape(n, c_in, hw)

    # Weights: per-phase 9-tap packing (zeros in unused tap slots), phase-major
    # within each C_out tile so the 4 phases fuse into one matmul.
    wt = jnp.transpose(weight, (2, 3, 1, 0)).astype(jnp.float32)  # (kh,kw,C_out,C_in)
    w9 = jnp.zeros((2, 2, c_out, 9 * c_in), jnp.float32)
    for a in (0, 1):
        for b in (0, 1):
            for kh in _TAPS[a]:
                for kw in _TAPS[b]:
                    s = (_SHIFT[kh] + 1) * 3 + (_SHIFT[kw] + 1)
                    w9 = w9.at[a, b, :, s * c_in:(s + 1) * c_in].set(wt[kh, kw])
    # TODO(synk): for large C_in (>=~128) switch to per-tap accumulating matmuls
    # (K = C_in already fills the MXU) instead of the zero-padded 9-tap packing.
    w9 = (w9.reshape(4, n_co, co_tile, 9 * c_in)
            .transpose(1, 0, 2, 3)
            .reshape(n_co, 4 * co_tile, 9 * c_in)
            .astype(jnp.bfloat16))

    kernel = functools.partial(_unet_up_kernel, h=h, w=w, co_t=co_tile)
    out = pl.pallas_call(
        kernel,
        out_shape=jax.ShapeDtypeStruct((n, n_co, 4 * co_tile, hw), jnp.bfloat16),
        grid=(n, n_co),
        in_specs=[
            pl.BlockSpec((None, c_in, hw), lambda i, j: (i, 0, 0)),
            pl.BlockSpec((None, 4 * co_tile, 9 * c_in), lambda i, j: (j, 0, 0)),
        ],
        out_specs=pl.BlockSpec((None, None, 4 * co_tile, hw),
                               lambda i, j: (i, j, 0, 0)),
        compiler_params=pltpu.CompilerParams(
            dimension_semantics=("parallel", "parallel"),
            vmem_limit_bytes=vmem_limit),
    )(x2, w9)

    # (N, n_co, 4*CO_T, HW) -> (N, C_out, 2H, 2W); done in bf16 (half the bytes).
    y = out.reshape(n, n_co, 2, 2, co_tile, h, w)        # [n, j, a, b, c, p, q]
    y = jnp.transpose(y, (0, 1, 4, 5, 2, 6, 3))          # [n, j, c, p, a, q, b]
    y = y.reshape(n, c_out, 2 * h, 2 * w)
    # NOTE: dropout=0.0 in this instantiation -> no Dropout layer is present.
    # TODO(synk): the remaining transpose + concat HBM pass is removable by doing
    # the (a,b) interleave in-kernel (u32 bf16-pair packing) and writing into a
    # pre-allocated concat buffer via input_output_aliases.
    return jnp.concatenate([y, skip.astype(jnp.bfloat16)], axis=1)


def ref_unet_up(x, weight, skip):
    """Pure-JAX f32 reference (conv_transpose via lhs-dilated conv, flipped kernel)."""
    rhs = jnp.transpose(weight[:, :, ::-1, ::-1], (1, 0, 2, 3))  # OIHW
    y = lax.conv_general_dilated(
        x, rhs, window_strides=(1, 1), padding=((2, 2), (2, 2)),
        lhs_dilation=(2, 2), dimension_numbers=("NCHW", "OIHW", "NCHW"))
    mean = y.mean(axis=(2, 3), keepdims=True)
    var = y.var(axis=(2, 3), keepdims=True)
    y = (y - mean) / jnp.sqrt(var + EPS)
    y = jnp.maximum(y, 0.0)
    return jnp.concatenate([y, skip], axis=1)


if __name__ == "__main__":
    key = jax.random.PRNGKey(0)
    k1, k2, k3 = jax.random.split(key, 3)
    # H*W = 256 -> lane-dense (multiple of 128) input and output blocks.
    N, C_IN, C_OUT, H, W = 2, 8, 8, 16, 16

    x = jax.random.normal(k1, (N, C_IN, H, W), jnp.float32)
    skip = jax.random.normal(k2, (N, C_OUT, 2 * H, 2 * W), jnp.float32)
    # ConvTranspose2d weight: (in_size, out_size, 4, 4)
    weight = 0.1 * jax.random.normal(k3, (C_IN, C_OUT, 4, 4), jnp.float32)

    out = jax.block_until_ready(unet_up_forward(x, weight, skip))
    ref = jax.block_until_ready(ref_unet_up(x, weight, skip))

    assert out.shape == (N, 2 * C_OUT, 2 * H, 2 * W), out.shape
    # bf16 MXU operands + bf16 output/skip (f32 accumulation & stats) -> relaxed tol.
    np.testing.assert_allclose(np.asarray(out.astype(jnp.float32)),
                               np.asarray(ref), rtol=3e-2, atol=3e-2)
    print("KERNEL_OK")
</pallas_src>

<mosaic_0001>
module attributes {stable_mosaic.version = 11 : i64} {
  func.func @_unet_up_kernel(%arg0: i32, %arg1: i32, %arg2: memref<1x8x256xbf16, #tpu.memory_space<vmem>>, %arg3: memref<1x32x72xbf16, #tpu.memory_space<vmem>>, %arg4: memref<1x1x32x256xbf16, #tpu.memory_space<vmem>>) attributes {dimension_semantics = [#tpu.dimension_semantics<parallel>, #tpu.dimension_semantics<parallel>], iteration_bounds = array<i64: 2, 1>, scalar_prefetch = 0 : i64, scratch_operands = 0 : i64, tpu.core_type = #tpu.core_type<tc>, window_params = [{transform_indices = @transform_0, window_bounds = array<i64: 1, 8, 256>}, {transform_indices = @transform_1, window_bounds = array<i64: 1, 32, 72>}, {transform_indices = @transform_2, window_bounds = array<i64: 1, 1, 32, 256>}]} {
    %c0 = arith.constant 0 : index
    %c0_0 = arith.constant 0 : index
    %c0_1 = arith.constant 0 : index
    %0 = vector.load %arg2[%c0, %c0_0, %c0_1] : memref<1x8x256xbf16, #tpu.memory_space<vmem>>, vector<1x8x256xbf16>
    %1 = vector.shape_cast %0 : vector<1x8x256xbf16> to vector<8x256xbf16>
    %2 = arith.extf %1 : vector<8x256xbf16> to vector<8x256xf32>
    %3 = tpu.iota {dimensions = array<i32: 1>} : vector<1x256xi32>
    %c15_i32 = arith.constant 15 : i32
    %4 = vector.broadcast %c15_i32 : i32 to vector<1x256xi32>
    %5 = arith.andi %3, %4 : vector<1x256xi32>
    %c17_i32 = arith.constant 17 : i32
    %6 = tpu.dynamic_rotate %2 by %c17_i32 dim 1 : vector<8x256xf32>, i32 -> vector<8x256xf32>
    %c16_i32 = arith.constant 16 : i32
    %7 = vector.broadcast %c16_i32 : i32 to vector<1x256xi32>
    %8 = arith.cmpi sge, %3, %7 : vector<1x256xi32>
    %c1_i32 = arith.constant 1 : i32
    %9 = vector.broadcast %c1_i32 : i32 to vector<1x256xi32>
    %10 = arith.cmpi sge, %5, %9 : vector<1x256xi32>
    %11 = arith.andi %8, %10 : vector<1x256xi1>
    %cst = arith.constant 0.000000e+00 : f32
    %12 = vector.shape_cast %11 : vector<1x256xi1> to vector<1x256xi1>
    %13 = vector.broadcast %12 : vector<1x256xi1> to vector<8x256xi1>
    %14 = vector.broadcast %cst : f32 to vector<8x256xf32>
    %15 = arith.select %13, %6, %14 : vector<8x256xi1>, vector<8x256xf32>
    %16 = arith.truncf %15 : vector<8x256xf32> to vector<8x256xbf16>
    %c16_i32_2 = arith.constant 16 : i32
    %17 = tpu.dynamic_rotate %2 by %c16_i32_2 dim 1 : vector<8x256xf32>, i32 -> vector<8x256xf32>
    %c16_i32_3 = arith.constant 16 : i32
    %18 = vector.broadcast %c16_i32_3 : i32 to vector<1x256xi32>
    %19 = arith.cmpi sge, %3, %18 : vector<1x256xi32>
    %cst_4 = arith.constant 0.000000e+00 : f32
    %20 = vector.shape_cast %19 : vector<1x256xi1> to vector<1x256xi1>
    %21 = vector.broadcast %20 : vector<1x256xi1> to vector<8x256xi1>
    %22 = vector.broadcast %cst_4 : f32 to vector<8x256xf32>
    %23 = arith.select %21, %17, %22 : vector<8x256xi1>, vector<8x256xf32>
    %24 = arith.truncf %23 : vector<8x256xf32> to vector<8x256xbf16>
    %c15_i32_5 = arith.constant 15 : i32
    %25 = tpu.dynamic_rotate %2 by %c15_i32_5 dim 1 : vector<8x256xf32>, i32 -> vector<8x256xf32>
    %c16_i32_6 = arith.constant 16 : i32
    %26 = vector.broadcast %c16_i32_6 : i32 to vector<1x256xi32>
    %27 = arith.cmpi sge, %3, %26 : vector<1x256xi32>
    %c15_i32_7 = arith.constant 15 : i32
    %28 = vector.broadcast %c15_i32_7 : i32 to vector<1x256xi32>
    %29 = arith.cmpi slt, %5, %28 : vector<1x256xi32>
    %30 = arith.andi %27, %29 : vector<1x256xi1>
    %cst_8 = arith.constant 0.000000e+00 : f32
    %31 = vector.shape_cast %30 : vector<1x256xi1> to vector<1x256xi1>
    %32 = vector.broadcast %31 : vector<1x256xi1> to vector<8x256xi1>
    %33 = vector.broadcast %cst_8 : f32 to vector<8x256xf32>
    %34 = arith.select %32, %25, %33 : vector<8x256xi1>, vector<8x256xf32>
    %35 = arith.truncf %34 : vector<8x256xf32> to vector<8x256xbf16>
    %c1_i32_9 = arith.constant 1 : i32
    %36 = tpu.dynamic_rotate %2 by %c1_i32_9 dim 1 : vector<8x256xf32>, i32 -> vector<8x256xf32>
    %c1_i32_10 = arith.constant 1 : i32
    %37 = vector.broadcast %c1_i32_10 : i32 to vector<1x256xi32>
    %38 = arith.cmpi sge, %5, %37 : vector<1x256xi32>
    %cst_11 = arith.constant 0.000000e+00 : f32
    %39 = vector.shape_cast %38 : vector<1x256xi1> to vector<1x256xi1>
    %40 = vector.broadcast %39 : vector<1x256xi1> to vector<8x256xi1>
    %41 = vector.broadcast %cst_11 : f32 to vector<8x256xf32>
    %42 = arith.select %40, %36, %41 : vector<8x256xi1>, vector<8x256xf32>
    %43 = arith.truncf %42 : vector<8x256xf32> to vector<8x256xbf16>
    %44 = arith.truncf %2 : vector<8x256xf32> to vector<8x256xbf16>
    %c255_i32 = arith.constant 255 : i32
    %45 = tpu.dynamic_rotate %2 by %c255_i32 dim 1 : vector<8x256xf32>, i32 -> vector<8x256xf32>
    %c15_i32_12 = arith.constant 15 : i32
    %46 = vector.broadcast %c15_i32_12 : i32 to vector<1x256xi32>
    %47 = arith.cmpi slt, %5, %46 : vector<1x256xi32>
    %cst_13 = arith.constant 0.000000e+00 : f32
    %48 = vector.shape_cast %47 : vector<1x256xi1> to vector<1x256xi1>
    %49 = vector.broadcast %48 : vector<1x256xi1> to vector<8x256xi1>
    %50 = vector.broadcast %cst_13 : f32 to vector<8x256xf32>
    %51 = arith.select %49, %45, %50 : vector<8x256xi1>, vector<8x256xf32>
    %52 = arith.truncf %51 : vector<8x256xf32> to vector<8x256xbf16>
    %c241_i32 = arith.constant 241 : i32
    %53 = tpu.dynamic_rotate %2 by %c241_i32 dim 1 : vector<8x256xf32>, i32 -> vector<8x256xf32>
    %c240_i32 = arith.constant 240 : i32
    %54 = vector.broadcast %c240_i32 : i32 to vector<1x256xi32>
    %55 = arith.cmpi slt, %3, %54 : vector<1x256xi32>
    %c1_i32_14 = arith.constant 1 : i32
    %56 = vector.broadcast %c1_i32_14 : i32 to vector<1x256xi32>
    %57 = arith.cmpi sge, %5, %56 : vector<1x256xi32>
    %58 = arith.andi %55, %57 : vector<1x256xi1>
    %cst_15 = arith.constant 0.000000e+00 : f32
    %59 = vector.shape_cast %58 : vector<1x256xi1> to vector<1x256xi1>
    %60 = vector.broadcast %59 : vector<1x256xi1> to vector<8x256xi1>
    %61 = vector.broadcast %cst_15 : f32 to vector<8x256xf32>
    %62 = arith.select %60, %53, %61 : vector<8x256xi1>, vector<8x256xf32>
    %63 = arith.truncf %62 : vector<8x256xf32> to vector<8x256xbf16>
    %c240_i32_16 = arith.constant 240 : i32
    %64 = tpu.dynamic_rotate %2 by %c240_i32_16 dim 1 : vector<8x256xf32>, i32 -> vector<8x256xf32>
    %c240_i32_17 = arith.constant 240 : i32
    %65 = vector.broadcast %c240_i32_17 : i32 to vector<1x256xi32>
    %66 = arith.cmpi slt, %3, %65 : vector<1x256xi32>
    %cst_18 = arith.constant 0.000000e+00 : f32
    %67 = vector.shape_cast %66 : vector<1x256xi1> to vector<1x256xi1>
    %68 = vector.broadcast %67 : vector<1x256xi1> to vector<8x256xi1>
    %69 = vector.broadcast %cst_18 : f32 to vector<8x256xf32>
    %70 = arith.select %68, %64, %69 : vector<8x256xi1>, vector<8x256xf32>
    %71 = arith.truncf %70 : vector<8x256xf32> to vector<8x256xbf16>
    %c239_i32 = arith.constant 239 : i32
    %72 = tpu.dynamic_rotate %2 by %c239_i32 dim 1 : vector<8x256xf32>, i32 -> vector<8x256xf32>
    %c240_i32_19 = arith.constant 240 : i32
    %73 = vector.broadcast %c240_i32_19 : i32 to vector<1x256xi32>
    %74 = arith.cmpi slt, %3, %73 : vector<1x256xi32>
    %c15_i32_20 = arith.constant 15 : i32
    %75 = vector.broadcast %c15_i32_20 : i32 to vector<1x256xi32>
    %76 = arith.cmpi slt, %5, %75 : vector<1x256xi32>
    %77 = arith.andi %74, %76 : vector<1x256xi1>
    %cst_21 = arith.constant 0.000000e+00 : f32
    %78 = vector.shape_cast %77 : vector<1x256xi1> to vector<1x256xi1>
    %79 = vector.broadcast %78 : vector<1x256xi1> to vector<8x256xi1>
    %80 = vector.broadcast %cst_21 : f32 to vector<8x256xf32>
    %81 = arith.select %79, %72, %80 : vector<8x256xi1>, vector<8x256xf32>
    %82 = arith.truncf %81 : vector<8x256xf32> to vector<8x256xbf16>
    %83 = tpu.concatenate %16, %24, %35, %43, %44, %52, %63, %71, %82 in 0 : vector<8x256xbf16>, vector<8x256xbf16>, vector<8x256xbf16>, vector<8x256xbf16>, vector<8x256xbf16>, vector<8x256xbf16>, vector<8x256xbf16>, vector<8x256xbf16>, vector<8x256xbf16> -> vector<72x256xbf16>
    %c0_22 = arith.constant 0 : index
    %c0_23 = arith.constant 0 : index
    %c0_24 = arith.constant 0 : index
    %84 = vector.load %arg3[%c0_22, %c0_23, %c0_24] : memref<1x32x72xbf16, #tpu.memory_space<vmem>>, vector<1x32x72xbf16>
    %85 = vector.shape_cast %84 : vector<1x32x72xbf16> to vector<32x72xbf16>
    %cst_25 = arith.constant dense<0.000000e+00> : vector<32x256xf32>
    %86 = tpu.matmul %85, %83, %cst_25 {dimension_numbers = #tpu.dot_dimension_numbers<[1], [0], [0], [1], [0, 0, 1, 1], [], []>} : vector<32x72xbf16>, vector<72x256xbf16>, vector<32x256xf32> -> vector<32x256xf32>
    %cst_26 = arith.constant dense<0.000000e+00> : vector<32xf32>
    %87 = vector.multi_reduction <add>, %86, %cst_26 [1] : vector<32x256xf32> to vector<32xf32>
    %88 = vector.shape_cast %87 : vector<32xf32> to vector<32x1xf32>
    %89 = arith.mulf %86, %86 : vector<32x256xf32>
    %cst_27 = arith.constant dense<0.000000e+00> : vector<32xf32>
    %90 = vector.multi_reduction <add>, %89, %cst_27 [1] : vector<32x256xf32> to vector<32xf32>
    %91 = vector.shape_cast %90 : vector<32xf32> to vector<32x1xf32>
    %92 = vector.extract_strided_slice %88 {offsets = [0, 0], sizes = [8, 1], strides = [1, 1]} : vector<32x1xf32> to vector<8x1xf32>
    %93 = vector.extract_strided_slice %88 {offsets = [8, 0], sizes = [8, 1], strides = [1, 1]} : vector<32x1xf32> to vector<8x1xf32>
    %94 = arith.addf %92, %93 : vector<8x1xf32>
    %95 = vector.extract_strided_slice %88 {offsets = [16, 0], sizes = [8, 1], strides = [1, 1]} : vector<32x1xf32> to vector<8x1xf32>
    %96 = arith.addf %94, %95 : vector<8x1xf32>
    %97 = vector.extract_strided_slice %88 {offsets = [24, 0], sizes = [8, 1], strides = [1, 1]} : vector<32x1xf32> to vector<8x1xf32>
    %98 = arith.addf %96, %97 : vector<8x1xf32>
    %99 = vector.extract_strided_slice %91 {offsets = [0, 0], sizes = [8, 1], strides = [1, 1]} : vector<32x1xf32> to vector<8x1xf32>
    %100 = vector.extract_strided_slice %91 {offsets = [8, 0], sizes = [8, 1], strides = [1, 1]} : vector<32x1xf32> to vector<8x1xf32>
    %101 = arith.addf %99, %100 : vector<8x1xf32>
    %102 = vector.extract_strided_slice %91 {offsets = [16, 0], sizes = [8, 1], strides = [1, 1]} : vector<32x1xf32> to vector<8x1xf32>
    %103 = arith.addf %101, %102 : vector<8x1xf32>
    %104 = vector.extract_strided_slice %91 {offsets = [24, 0], sizes = [8, 1], strides = [1, 1]} : vector<32x1xf32> to vector<8x1xf32>
    %105 = arith.addf %103, %104 : vector<8x1xf32>
    %cst_28 = arith.constant 9.765625E-4 : f32
    %106 = vector.broadcast %cst_28 : f32 to vector<8x1xf32>
    %107 = arith.mulf %98, %106 : vector<8x1xf32>
    %cst_29 = arith.constant 9.765625E-4 : f32
    %108 = vector.broadcast %cst_29 : f32 to vector<8x1xf32>
    %109 = arith.mulf %105, %108 : vector<8x1xf32>
    %110 = arith.mulf %107, %107 : vector<8x1xf32>
    %111 = arith.subf %109, %110 : vector<8x1xf32>
    %cst_30 = arith.constant 0.000000e+00 : f32
    %112 = vector.broadcast %cst_30 : f32 to vector<8x1xf32>
    %113 = arith.maximumf %111, %112 : vector<8x1xf32>
    %cst_31 = arith.constant 9.99999974E-6 : f32
    %114 = vector.broadcast %cst_31 : f32 to vector<8x1xf32>
    %115 = arith.addf %113, %114 : vector<8x1xf32>
    %116 = math.rsqrt %115 : vector<8x1xf32>
    %117 = tpu.concatenate %107, %107, %107, %107 in 0 : vector<8x1xf32>, vector<8x1xf32>, vector<8x1xf32>, vector<8x1xf32> -> vector<32x1xf32>
    %118 = tpu.concatenate %116, %116, %116, %116 in 0 : vector<8x1xf32>, vector<8x1xf32>, vector<8x1xf32>, vector<8x1xf32> -> vector<32x1xf32>
    %119 = vector.broadcast %117 : vector<32x1xf32> to vector<32x256xf32>
    %120 = arith.subf %86, %119 : vector<32x256xf32>
    %121 = vector.broadcast %118 : vector<32x1xf32> to vector<32x256xf32>
    %122 = arith.mulf %120, %121 : vector<32x256xf32>
    %cst_32 = arith.constant 0.000000e+00 : f32
    %123 = vector.broadcast %cst_32 : f32 to vector<32x256xf32>
    %124 = arith.maximumf %122, %123 : vector<32x256xf32>
    %125 = arith.truncf %124 : vector<32x256xf32> to vector<32x256xbf16>
    %c0_33 = arith.constant 0 : index
    %c0_34 = arith.constant 0 : index
    %c0_35 = arith.constant 0 : index
    %c0_36 = arith.constant 0 : index
    %126 = vector.load %arg4[%c0_33, %c0_34, %c0_35, %c0_36] : memref<1x1x32x256xbf16, #tpu.memory_space<vmem>>, vector<1x1x32x256xbf16>
    %127 = vector.shape_cast %126 : vector<1x1x32x256xbf16> to vector<32x256xbf16>
    %128 = vector.shape_cast %125 : vector<32x256xbf16> to vector<1x1x32x256xbf16>
    tpu.vector_store %arg4[%c0_33, %c0_34, %c0_35, %c0_36], %128 {strides = array<i32>} : memref<1x1x32x256xbf16, #tpu.memory_space<vmem>>, vector<1x1x32x256xbf16>,
    return
  }
  func.func @transform_0(%arg0: i32, %arg1: i32) -> (i32, i32, i32) {
    %c0_i32 = arith.constant 0 : i32
    %c0_i32_0 = arith.constant 0 : i32
    %c0_i32_1 = arith.constant 0 : i32
    return %arg0, %c0_i32, %c0_i32_0 : i32, i32, i32
  }
  func.func @transform_1(%arg0: i32, %arg1: i32) -> (i32, i32, i32) {
    %c0_i32 = arith.constant 0 : i32
    %c0_i32_0 = arith.constant 0 : i32
    %c0_i32_1 = arith.constant 0 : i32
    return %arg1, %c0_i32, %c0_i32_0 : i32, i32, i32
  }
  func.func @transform_2(%arg0: i32, %arg1: i32) -> (i32, i32, i32, i32) {
    %c0_i32 = arith.constant 0 : i32
    %c0_i32_0 = arith.constant 0 : i32
    %c0_i32_1 = arith.constant 0 : i32
    return %arg0, %arg1, %c0_i32, %c0_i32_0 : i32, i32, i32, i32
  }
}

</mosaic_0001>

<bundles_post_ra>
// kernel: tpu_custom_call.1
= control target key start
LH: loop header
LB: loop body
LE: loop exit
PB: predicated region body
PF: predicated region fallthrough
CT: control target
= control target key end

     0   :  { %7 = vsyncpa [#allocation3], 0  ;;  %s1429_s0 = inlined_call_operand.hbm [shape: bf16[2,8,256], index: 0, kind: input, shape index: {}]   ;;  %s1430_s1 = inlined_call_operand.hbm [shape: bf16[1,32,72], index: 1, kind: input, shape index: {}]   ;;  %s1431_s2 = inlined_call_operand.hbm [shape: bf16[2,1,32,256], index: 2, kind: output, shape index: {}]  }
   0x1   :  { %9 = vsyncpa [#allocation3 + $0x1], 0 }
   0x2   :  { %10 = vsyncpa [#allocation6], 0 }
   0x3   :  { %11 = vsyncpa [#allocation4], 0 }
   0x4   :  { %13 = vsyncpa [#allocation4 + $0x1], 0  ;;  %s1050_s9 = smov 0   ;;  %s1052_s10 = smov 0  }
   0x5   :  { %s1054_s11 = smov 0   ;;  %s1056_s12 = smov 0  }
   0x6   :  { %s1058_s13 = smov 0   ;;  %s1060_s14 = smov 0  }
   0x7 LB: > { %s695_s15 = sadd.s32 4294967295, %s1017_s14   ;;  %s696_s16 = sadd.s32 4294967294, %s1017_s14   ;;  %s1017_s14 = sphi %s1060_s14, %s19_s14   ;;  %s1013_s13 = sphi %s1058_s13, %s1463_s13   ;;  %s1009_s12 = sphi %s1056_s12, %s1462_s12   ;;  %s1005_s11 = sphi %s1054_s11, %s1461_s11   ;;  %s1001_s10 = sphi %s1052_s10, %s1460_s10   ;;  %s997_s9 = sphi %s1050_s9, %s1459_s9  }
   0x8   : > { %p51_p0 = scmp.ne.s32.totalorder %s1001_s10, %s997_s9  ;;  %p1084_p1 = scmp.eq.s32.totalorder %s695_s15, 0 }
   0x9   : > { %p1088_p2 = scmp.eq.s32.totalorder %s695_s15, 1  ;;  %p109_p3 = scmp.eq.s32.totalorder %s696_s16, 1 }
   0xa   : > { %s1436_s17 = scalar_select %p1084_p1, 1, 0 }
   0xb   : > { %s1437_s18 = scalar_select %p1088_p2, 1, 0 }
   0xc   : > { %p1094_p4 = por %p1084_p1, %p51_p0  ;;  %p697_p5 = scmp.ge.s32.totalorder %s1017_s14, 1 }
   0xd   : > { %p1099_p6 = por %p109_p3, %p51_p0  ;;  %p116_p7 = scmp.lt.s32.totalorder %s1017_s14, 3 }
   0xe   : > { %s1438_s19 = scalar_select %p1094_p4, 1, 0 }
   0xf   : > { %s1439_s20 = scalar_select %p1099_p6, 1, 0 }
  0x10   : > { %p1104_p8 = pnand %p697_p5, %p116_p7  ;;  %s1019_s22 = smov [#allocation5]  }
  0x11   : > { %s131_s23 = sshll.u32 %s1019_s22, 4  ;;  %s31_s25 = sadd.s32 1, %s1013_s13  ;;  %s132_s23 = int_to_ptr.vmem [resolvable:$true] %s131_s23 }
  0x12   : > { %s1440_s21 = scalar_select %p1104_p8, 1, 0 }
  0x13   : > { %p747_p9 = pneg %p1104_p8  ;;  %s873_s28 = scalar_lea.hbm %s1430_s1, 256 }
  0x14   : > { %p874_p12 = scmp.ne.s32.totalorder %s1430_s1, %s873_s28  ;;  %p880_p5 = scmp.lt.u32.totalorder %s873_s28, %s1430_s1 }
  0x15   : > { %p1113_p11 = pnand %p747_p9, %p1084_p1 }
  0x17   : > { %p875_p13 = pneg %p1113_p11 }
  0x19   : > { %p876_p0 = pnand %p875_p13, %p874_p12 }
  0x1b   : > { %p877_p3 = pneg %p876_p0 }
  0x1d   : > { %p882_p7 = pnand %p880_p5, %p877_p3 }
  0x1f   : > { %885 = shalt.err (!%p882_p7)
}
  0x20   : > { %s886_s5 = scalar_lea.vmem %s132_s23, 256  ;;  %p894_p1 = scmp.lt.s32.totalorder %s132_s23, %s132_s23 }
  0x21   : > { %p887_p9 = scmp.ne.s32.totalorder %s132_s23, %s886_s5  ;;  %p895_p4 = scmp.lt.s32.totalorder %s886_s5, %s886_s5 }
  0x23   : > { %p889_p10 = pnand %p887_p9, %p875_p13  ;;  %p896_p8 = por %p895_p4, %p894_p1 }
  0x25   : > { %p890_p6 = pneg %p889_p10 }
  0x27   : > { %p897_p2 = pnand %p896_p8, %p890_p6 }
  0x29   : > { %900 = shalt.err (!%p897_p2)
}
  0x2a   : > { %s1020_s6 = smov 64   ;;  %s1021_s7 = smov 4  }
  0x2b   : > { %750 = dma.hbm_to_vmem [thread:$0]  (!%p1113_p11), %s1430_s1, 256, %s132_s23, [#allocation6], %s1020_s6, %s1020_s6, %s1021_s7  }
  0x2c   : > { %p33_p1 = scmp.ge.s32.totalorder %s31_s25, 2  ;;  %s38_s16 = sadd.s32 1, %s1005_s11 }
  0x2d   : > { %p45_p2 = scmp.ne.s32.totalorder %s1005_s11, %s1001_s10  ;;  %p46_p4 = scmp.eq.s32.totalorder %s1017_s14, 0 }
  0x2e   : > { %s1465_s25 = smov (%p33_p1, %s31_s25), 0  ;;  %p1443_p8 = scmp.ne.s32.totalorder %s1437_s18, 0 }
  0x2f   : > { %p1140_p6 = por %p46_p4, %p45_p2  ;;  %s35_s24 = ssub.s32 %s1013_s13, %s1465_s25 }
  0x30   : > { %p1146_p10 = por %p1443_p8, %p45_p2  ;;  %p760_p12 = scmp.lt.s32.totalorder %s1017_s14, 2 }
  0x31   : > { %p36_p11 = scmp.eq.s32.totalorder %s35_s24, 0  ;;  %s145_s23 = sand.u32 1, %s1005_s11  }
  0x32   : > { %s700_s27 = sshll.u32 %s145_s23, 3  ;;  %s723_s29 = sshll.u32 %s1013_s13, 7 }
  0x33   : > { %s1155_s28 = scalar_select %p36_p11, %s1005_s11, %s38_s16  }
  0x34   : > { %s1161_s4 = scalar_lea.hbm %s1429_s0, %s723_s29  ;;  %s149_s18 = scalar_lea.vmem [#allocation2], %s700_s27 }
  0x35   : > { %s157_s5 = sshll.u32 %s149_s18, 4  ;;  %p1167_p13 = pnand %p760_p12, %p1140_p6  ;;  %s1163_s5 = int_to_ptr.vmem [resolvable:$true] %s157_s5 }
  0x36   : > { %s146_s7 = scalar_lea.sflag [#allocation3], %s145_s23  ;;  %s901_s8 = scalar_lea.hbm %s1161_s4, 128 }
  0x37   : > { %p902_p0 = scmp.ne.s32.totalorder %s1161_s4, %s901_s8  ;;  %p903_p3 = pneg %p1167_p13 }
  0x38   : > { %s906_s24 = scalar_lea.hbm %s1429_s0, 256  ;;  %p907_p9 = scmp.lt.u32.totalorder %s1161_s4, %s1429_s0 }
  0x39   : > { %p904_p5 = pnand %p903_p3, %p902_p0  ;;  %p908_p1 = scmp.lt.u32.totalorder %s906_s24, %s901_s8 }
  0x3a   : > { %p910_p4 = scmp.lt.u32.totalorder %s901_s8, %s1161_s4 }
  0x3b   : > { %p905_p7 = pneg %p904_p5  ;;  %p909_p2 = por %p908_p1, %p907_p9 }
  0x3d   : > { %p911_p6 = por %p910_p4, %p909_p2 }
  0x3f   : > { %p912_p8 = pnand %p911_p6, %p905_p7 }
  0x41   : > { %915 = shalt.err (!%p912_p8)
}
  0x42   : > { %s916_s23 = scalar_lea.vmem %s1163_s5, 128  ;;  %s1022_s29 = smov [#allocation2]  }
  0x43   : > { %p917_p12 = scmp.ne.s32.totalorder %s1163_s5, %s916_s23  ;;  %s921_s30 = sshll.u32 %s1022_s29, 4  ;;  %s922_s30 = int_to_ptr.vmem [resolvable:$false] %s921_s30 }
  0x44   : > { %s923_s3 = scalar_lea.vmem %s922_s30, 256  ;;  %p924_p5 = scmp.lt.s32.totalorder %s1163_s5, %s922_s30 }
  0x45   : > { %p919_p11 = pnand %p917_p12, %p903_p3  ;;  %p925_p9 = scmp.lt.s32.totalorder %s923_s3, %s916_s23 }
  0x47   : > { %p920_p0 = pneg %p919_p11  ;;  %p926_p1 = por %p925_p9, %p924_p5 }
  0x49   : > { %p927_p2 = pnand %p926_p1, %p920_p0 }
  0x4b   : > { %930 = shalt.err (!%p927_p2)
}
  0x4c   : > { %754 = dma.hbm_to_vmem [thread:$0]  (!%p1167_p13), %s1161_s4, 128, %s1163_s5, %s146_s7  }
  0x4d   : > { %p1446_p7 = scmp.ne.s32.totalorder %s1440_s21, 0 }
  0x4e   : > { %s1199_s18 = sand.u32 (!%p1446_p7), 1, %s1001_s10   ;;  %p1447_p3 = scmp.ne.s32.totalorder (!%p1446_p7), %s1438_s19, 0 }
  0x4f   : > { %166 = sbr.rel (%p1446_p7) target bundleno = 785 (0x311), region = 28  ;;  %s704_s8 = sshll.u32 (!%p1446_p7), %s1199_s18, 3 }
  0x50   : > { %s169_s15 = scalar_lea.sflag (!%p1446_p7), [#allocation3], %s1199_s18  ;;  %s172_s16 = scalar_lea.vmem (!%p1446_p7), [#allocation2], %s704_s8 }
  0x56   : > { %984 = dma.done.wait (%p1447_p3), %s169_s15, 128  }
  0x57   : > { %986 = vsyncadd (%p1447_p3), %s169_s15, 4294967168  ;;  %p1448_p4 = scmp.ne.s32.totalorder %s1436_s17, 0 }
  0x59   : > { %988 = dma.done.wait (%p1448_p4), [#allocation6], 256  }
  0x5a   : > { %990 = vsyncadd (%p1448_p4), [#allocation6], 4294967040  ;;  %v1211_v0 = vld [vmem:[%s172_s16] sm:$0xff]  ;;  %s1023_s21 = smov 16   ;;  %s1024_s4 = smov 1   ;;  %v1031_v4 = vmov 0   ;;  %v201_v5 = vlaneseq }
  0x5b   : > { %v199_v1 = vunpack.c.l.bf16 %v1211_v0  ;;  %v200_v2 = vunpack.c.h.bf16 %v1211_v0  ;;  %s1025_s5 = smov 17   ;;  %s1026_s19 = smov 15   ;;  %455 = vmatprep.mubr.bf16.mxu0 %v1031_v4  ;;  %465 = vmatprep.mubr.bf16.mxu1 %v1031_v4  ;;  %vm363_vm8 = vcmask 1043456   ;;  %v708_v20 = vcombine.high %v1211_v0, %v1211_v0  ;;  %v869_v15 = vld [vmem:[#allocation5] sm:$0xff]  }
  0x5c   : > { %s1027_s6 = smov 127   ;;  %s1028_s7 = smov 112   ;;  %865 = vset.pattern.permute.xlu1 %v1031_v4  ;;  %866 = vset.pattern.permute.xlu0 %v1031_v4  ;;  %v1215_v6 = vand.u32 127, %v201_v5  ;;  %v707_v21 = vcombine.low %v1211_v0, %v1211_v0 }
  0x5d   : > { %v825_v3 = vpack.i.bf16 %v200_v2, %v199_v1  ;;  %s1029_s17 = smov 113   ;;  %s1030_s24 = smov 111  }
  0x5e   : > { %v1218_v7 = vadd.s32 128, %v1215_v6  ;;  %v204_v8 = vand.u32 15, %v1215_v6  ;;  %vm231_vm0 = vcmp.lt.s32.totalorder %v1215_v6, 16  ;;  %vm265_vm1 = vcmp.lt.s32.totalorder %v1215_v6, 1  ;;  %s706_s22 = sshll.u32 %s1199_s18, 5  ;;  %s728_s27 = sshll.u32 %s1009_s12, 9 }
  0x5f   : > { %826 = vrot.lane.b32.xlu0 %v825_v3, %s1023_s21  ;;  %836 = vrot.lane.b32.xlu1 %v825_v3, %s1024_s4  ;;  %vm246_vm2 = vcmp.lt.s32.totalorder %v1215_v6, 15  ;;  %vm210_vm3 = vcmp.lt.s32.totalorder %v1215_v6, 17  ;;  %vm213_vm4 = vcmp.ge.s32.totalorder %v1215_v6, 16  ;;  %vm280_vm6 = vcmp.lt.s32.totalorder %v1215_v6, 127  ;;  %s196_s23 = scalar_lea.vmem [#allocation7], %s706_s22  ;;  %s1378_s8 = scalar_lea.hbm %s1431_s2, %s728_s27 }
  0x60   : > { %v205_v9 = vand.u32 15, %v1218_v7  ;;  %vm1227_vm5 = vcmp.ge.s32.totalorder %v204_v8, 1  ;;  %vm1240_vm10 = vcmp.lt.s32.totalorder %v204_v8, 15  ;;  %vm314_vm11 = vcmp.lt.s32.totalorder %v1215_v6, 112  ;;  %s599_s29 = sshll.u32 %s196_s23, 4  ;;  %s584_s12 = scalar_lea.sflag [#allocation4], %s1199_s18  ;;  %s1380_s29 = int_to_ptr.vmem [resolvable:$true] %s599_s29 }
  0x61   : > { %vm299_vm12 = vcmp.lt.s32.totalorder %v1218_v7, 240  ;;  %vm295_vm13 = vcmp.lt.s32.totalorder %v1215_v6, 113  ;;  %vm217_vm14 = vmand %vm213_vm4, %vm1227_vm5  ;;  %vm329_vm15 = vcmp.lt.s32.totalorder %v1215_v6, 111  ;;  %s931_s15 = scalar_lea.vmem %s1380_s29, 512  ;;  %s1032_s16 = smov [#allocation7]  }
  0x62   : > { %vm1232_vm7 = vcmp.ge.s32.totalorder %v205_v9, 1  ;;  %vm1236_vm9 = vcmp.lt.s32.totalorder %v205_v9, 15  ;;  %p932_p13 = scmp.ne.s32.totalorder %s1380_s29, %s931_s15  ;;  %s935_s21 = sshll.u32 %s1032_s16, 4  ;;  %s936_s21 = int_to_ptr.vmem [resolvable:$false] %s935_s21 }
  0x63   : > { %831 = vrot.lane.b32.xlu0 %v825_v3, %s1025_s5  ;;  %841 = vrot.lane.b32.xlu1 %v825_v3, %s1026_s19  ;;  %s937_s4 = scalar_lea.vmem %s936_s21, 1024  ;;  %p938_p12 = scmp.lt.s32.totalorder %s1380_s29, %s936_s21 }
  0x64   : > { %p933_p6 = pnand %p932_p13, %p1146_p10  ;;  %p939_p11 = scmp.lt.s32.totalorder %s937_s4, %s931_s15 }
  0x66   : > { %p934_p8 = pneg %p933_p6  ;;  %p940_p0 = por %p939_p11, %p938_p12 }
  0x67   : > { %846 = vrot.lane.b32.xlu0 %v825_v3, %s1027_s6  ;;  %851 = vrot.lane.b32.xlu1 %v825_v3, %s1028_s7 }
  0x68   : > { %p941_p5 = pnand %p940_p0, %p934_p8 }
  0x6b   : > { %856 = vrot.lane.b32.xlu0 %v825_v3, %s1029_s17  ;;  %861 = vrot.lane.b32.xlu1 %v825_v3, %s1030_s24 }
  0xd1   : > { %v827_v11 = vpop.permute.xlu0 %826  ;;  %v837_v12 = vpop.permute.xlu1 %836 }
  0xd2   : > { %v829_v16 = vunpack.i.h.bf16 %v827_v11  ;;  %v828_v17 = vunpack.i.l.bf16 %v827_v11  ;;  %v839_v18 = vunpack.i.h.bf16 %v837_v12  ;;  %v838_v19 = vunpack.i.l.bf16 %v837_v12 }
  0xd4   : > { %v233_v22 = vsel %vm231_vm0, %v829_v16, %v828_v17  ;;  %v266_v23 = vsel %vm265_vm1, %v838_v19, %v839_v18  ;;  %v267_v24 = vsel %vm265_vm1, %v839_v18, %v838_v19  ;;  %v232_v25 = vsel %vm231_vm0, %v828_v17, %v829_v16  ;;  %vm251_vm0 = vmand %vm213_vm4, %vm1240_vm10 }
  0xd5   : > { %v832_v26 = vpop.permute.xlu0 %831  ;;  %v842_v27 = vpop.permute.xlu1 %841  ;;  %v241_v28 = vpack.c.bf16 %v232_v25, %v232_v25  ;;  %v238_v29 = vsel %vm213_vm4, %v233_v22, 0.0  ;;  %v273_v30 = vsel %vm1232_vm7, %v266_v23, 0.0  ;;  %v272_v31 = vsel %vm1227_vm5, %v267_v24, 0.0  ;;  %vm301_vm1 = vmand %vm299_vm12, %vm1232_vm7 }
  0xd6   : > { %v834_v32 = vunpack.i.h.bf16 %v832_v26  ;;  %v833_v33 = vunpack.i.l.bf16 %v832_v26  ;;  %v844_v34 = vunpack.i.h.bf16 %v842_v27  ;;  %v843_v35 = vunpack.i.l.bf16 %v842_v27 }
  0xd7   : > { %v345_v36 = vrot.slane %v241_v28, 4  ;;  %v240_v37 = vpack.c.bf16 %v238_v29, %v238_v29  ;;  %v275_v38 = vpack.c.bf16 %v273_v30, %v273_v30  ;;  %v274_v39 = vpack.c.bf16 %v272_v31, %v272_v31 }
  0xd8   : > { %v247_v40 = vsel %vm246_vm2, %v843_v35, %v844_v34  ;;  %v248_v41 = vsel %vm246_vm2, %v844_v34, %v843_v35  ;;  %v211_v42 = vsel %vm210_vm3, %v833_v33, %v834_v32  ;;  %v212_v43 = vsel %vm210_vm3, %v834_v32, %v833_v33  ;;  %vm333_vm2 = vmand %vm299_vm12, %vm1236_vm9 }
  0xd9   : > { %v847_v44 = vpop.permute.xlu0 %846  ;;  %v224_v45 = vsel %vm1232_vm7, %v211_v42, 0.0  ;;  %v223_v46 = vsel %vm217_vm14, %v212_v43, 0.0  ;;  %v344_v47 = vrot.slane %v240_v37, 4  ;;  %v852_v48 = vpop.permute.xlu1 %851  ;;  %v258_v49 = vsel %vm1236_vm9, %v247_v40, 0.0 }
  0xda   : > { %v849_v50 = vunpack.i.h.bf16 %v847_v44  ;;  %v848_v51 = vunpack.i.l.bf16 %v847_v44  ;;  %v226_v52 = vpack.c.bf16 %v224_v45, %v224_v45  ;;  %v225_v53 = vpack.c.bf16 %v223_v46, %v223_v46 }
  0xdb   : > { %v854_v54 = vunpack.i.h.bf16 %v852_v48  ;;  %v853_v55 = vunpack.i.l.bf16 %v852_v48  ;;  %v260_v56 = vpack.c.bf16 %v258_v49, %v258_v49  ;;  %v349_v57 = vrot.slane %v275_v38, 4 }
  0xdc   : > { %v281_v58 = vsel %vm280_vm6, %v848_v51, %v849_v50  ;;  %v282_v59 = vsel %vm280_vm6, %v849_v50, %v848_v51  ;;  %v370_v60 = vsel %vm363_vm8, %v226_v52, %v345_v36  ;;  %v366_v61 = vsel %vm363_vm8, %v225_v53, %v344_v47 }
  0xdd   : > { %423 = vmatprep.subr.bf16.mxu0 %v370_v60  ;;  %729 = vmatprep.subr.bf16.mxu1 %v370_v60  ;;  %v315_v62 = vsel %vm314_vm11, %v853_v55, %v854_v54  ;;  %v316_v63 = vsel %vm314_vm11, %v854_v54, %v853_v55  ;;  %v378_v1 = vsel %vm363_vm8, %v260_v56, %v349_v57  ;;  %v857_v2 = vpop.permute.xlu0 %856  ;;  %v257_v3 = vsel %vm251_vm0, %v248_v41, 0.0  ;;  %v862_v4 = vpop.permute.xlu1 %861 }
  0xde   : > { %424 = vmatpush1.bf16.msra.mxu0 %v366_v61  ;;  %734 = vmatpush1.bf16.msra.mxu1 %v366_v61  ;;  %v323_v5 = vpack.c.bf16 %v315_v62, %v315_v62  ;;  %v859_v8 = vunpack.i.h.bf16 %v857_v2  ;;  %v858_v9 = vunpack.i.l.bf16 %v857_v2  ;;  %v259_v11 = vpack.c.bf16 %v257_v3, %v257_v3 }
  0xdf   : > { %425 = vmatprep.subr.bf16.mxu0 %v378_v1  ;;  %730 = vmatprep.subr.bf16.mxu1 %v378_v1  ;;  %v348_v12 = vrot.slane %v274_v39, 4  ;;  %v288_v16 = vsel %vm1236_vm9, %v282_v59, 0.0  ;;  %v864_v17 = vunpack.i.h.bf16 %v862_v4  ;;  %v863_v18 = vunpack.i.l.bf16 %v862_v4 }
  0xe0   : > { %v296_v19 = vsel %vm295_vm13, %v858_v9, %v859_v8  ;;  %v297_v22 = vsel %vm295_vm13, %v859_v8, %v858_v9  ;;  %v290_v23 = vpack.c.bf16 %v288_v16, %v288_v16  ;;  %v287_v13 = vsel %vm1240_vm10, %v281_v58, 0.0 }
  0xe1   : > { %v374_v24 = vsel %vm363_vm8, %v259_v11, %v348_v12  ;;  %v331_v25 = vsel %vm329_vm15, %v864_v17, %v863_v18  ;;  %v289_v26 = vpack.c.bf16 %v287_v13, %v287_v13  ;;  %v307_v27 = vsel %vm301_vm1, %v297_v22, 0.0 }
  0xe2   : > { %426 = vmatpush1.bf16.msra.mxu0 %v374_v24  ;;  %735 = vmatpush1.bf16.msra.mxu1 %v374_v24  ;;  %v358_v28 = vrot.slane %v290_v23, 4  ;;  %v322_v29 = vsel %vm299_vm12, %v316_v63, 0.0  ;;  %v309_v31 = vpack.c.bf16 %v307_v27, %v307_v27  ;;  %v306_v14 = vsel %vm1227_vm5, %v296_v19, 0.0 }
  0xe3   : > { %v357_v30 = vrot.slane %v289_v26, 4  ;;  %v324_v32 = vpack.c.bf16 %v322_v29, %v322_v29  ;;  %v339_v34 = vsel %vm333_vm2, %v331_v25, 0.0  ;;  %v361_v35 = vrot.slane %v323_v5, 4 }
  0xe4   : > { %v386_v33 = vsel %vm363_vm8, %v708_v20, %v358_v28  ;;  %v330_v36 = vsel %vm329_vm15, %v863_v18, %v864_v17  ;;  %v308_v10 = vpack.c.bf16 %v306_v14, %v306_v14  ;;  %v341_v39 = vpack.c.bf16 %v339_v34, %v339_v34 }
  0xe5   : > { %427 = vmatprep.subr.bf16.mxu0 %v386_v33  ;;  %731 = vmatprep.subr.bf16.mxu1 %v386_v33  ;;  %v382_v7 = vsel %vm363_vm8, %v707_v21, %v357_v30  ;;  %v362_v37 = vrot.slane %v324_v32, 4  ;;  %v338_v38 = vsel %vm1240_vm10, %v330_v36, 0.0  ;;  %v870_v21 = vld [vmem:[#allocation5 + $0x8] sm:$0xff]   ;;  %vm410_vm3 = vcmask 588800  }
  0xe6   : > { %428 = vmatpush1.bf16.msra.mxu0 %v382_v7  ;;  %736 = vmatpush1.bf16.msra.mxu1 %v382_v7  ;;  %v340_v40 = vpack.c.bf16 %v338_v38, %v338_v38  ;;  %v390_v6 = vsel %vm363_vm8, %v308_v10, %v361_v35 }
  0xe7   : > { %v394_v20 = vsel %vm363_vm8, %v309_v31, %v362_v37 }
  0xe8   : > { %429 = vmatprep.subr.bf16.mxu0 %v394_v20  ;;  %732 = vmatprep.subr.bf16.mxu1 %v394_v20  ;;  %v418_v0 = vsel %vm363_vm8, %v340_v40, 0 }
  0xea   : > { %430 = vmatpush1.bf16.msra.mxu0 %v390_v6  ;;  %737 = vmatpush1.bf16.msra.mxu1 %v390_v6 }
  0xeb   : > { %711 = vmatprep.subr.msk.bf16.mxu0 %vm363_vm8, %v341_v39  ;;  %733 = vmatprep.subr.msk.bf16.mxu1 %vm363_vm8, %v341_v39 }
  0xee   : > { %432 = vmatpush1.bf16.msra.mxu0 %v418_v0  ;;  %738 = vmatpush1.bf16.msra.mxu1 %v418_v0 }
  0xf1   : > { %712 = vmatmul.mubr.msk.bf16.vlgmr.msra.gmra.mrb[0].mxu0 %vm410_vm3, %v869_v15  ;;  %713 = vmatmul.mubr.msk.bf16.vlgmr.msra.gmra.mrb[0].mxu1 %vm410_vm3, %v870_v21 }
 0x1c4   : > { %v1337_v41 = vpop.f32.mrb[0].mxu0  ;;  %v1339_v42 = vpop.f32.mrb[0].mxu1 }
 0x1c5   : > { %v1341_v43 = vpop.f32.mrb[1].mxu0  ;;  %v1343_v44 = vpop.f32.mrb[1].mxu1  ;;  %v488_v45 = vmul.f32 %v1337_v41, %v1337_v41  ;;  %v492_v46 = vmul.f32 %v1339_v42, %v1339_v42 }
 0x1c6   : > { %v1349_v47 = vpop.f32.mrb[2].mxu0  ;;  %v1351_v48 = vpop.f32.mrb[2].mxu1  ;;  %v476_v49 = vadd.f32 %v1341_v43, %v1337_v41  ;;  %v482_v50 = vadd.f32 %v1343_v44, %v1339_v42  ;;  %v489_v51 = vmul.f32 %v1341_v43, %v1341_v43  ;;  %v493_v52 = vmul.f32 %v1343_v44, %v1343_v44 }
 0x1c7   : > { %v463_v53 = vpop.f32.mrb[3].mxu0  ;;  %v473_v54 = vpop.f32.mrb[3].mxu1  ;;  %v490_v55 = vmul.f32 %v1349_v47, %v1349_v47  ;;  %v494_v56 = vmul.f32 %v1351_v48, %v1351_v48 }
 0x1c8   : > { %v491_v57 = vmul.f32 %v463_v53, %v463_v53  ;;  %v495_v58 = vmul.f32 %v473_v54, %v473_v54  ;;  %477 = vadd.xlane.f32.xlu0 %v476_v49  ;;  %v479_v59 = vadd.f32 %v463_v53, %v1349_v47  ;;  %v496_v60 = vadd.f32 %v489_v51, %v488_v45 }
 0x1c9   : > { %v502_v61 = vadd.f32 %v493_v52, %v492_v46  ;;  %v485_v62 = vadd.f32 %v473_v54, %v1351_v48 }
 0x1ca   : > { %480 = vadd.xlane.f32.xlu1 %v479_v59  ;;  %v499_v63 = vadd.f32 %v491_v57, %v490_v55  ;;  %v505_v1 = vadd.f32 %v495_v58, %v494_v56 }
 0x1cc   : > { %483 = vadd.xlane.f32.xlu0 %v482_v50 }
 0x1ce   : > { %500 = vadd.xlane.f32.xlu1 %v499_v63 }
 0x1d0   : > { %497 = vadd.xlane.f32.xlu0 %v496_v60 }
 0x1d2   : > { %503 = vadd.xlane.f32.xlu1 %v502_v61 }
 0x1d4   : > { %486 = vadd.xlane.f32.xlu0 %v485_v62 }
 0x1d8   : > { %506 = vadd.xlane.f32.xlu0 %v505_v1 }
 0x255   : > { %v478_v2 = vpop.xlane.xlu0 %477 }
 0x257   : > { %v481_v3 = vpop.xlane.xlu1 %480 }
 0x258   : > { %v508_v8 = vadd.f32 %v481_v3, %v478_v2 }
 0x259   : > { %v484_v4 = vpop.xlane.xlu0 %483 }
 0x25a   : > { %v509_v11 = vadd.f32 %v508_v8, %v484_v4 }
 0x25b   : > { %v501_v5 = vpop.xlane.xlu1 %500 }
 0x25d   : > { %v498_v9 = vpop.xlane.xlu0 %497 }
 0x25e   : > { %v511_v12 = vadd.f32 %v501_v5, %v498_v9 }
 0x25f   : > { %v504_v16 = vpop.xlane.xlu1 %503 }
 0x260   : > { %v512_v19 = vadd.f32 %v511_v12, %v504_v16 }
 0x261   : > { %v487_v17 = vpop.xlane.xlu0 %486 }
 0x262   : > { %v510_v18 = vadd.f32 %v509_v11, %v487_v17 }
 0x264   : > { %v514_v22 = vmul.f32 0.0009765625, %v510_v18 }
 0x265   : > { %v507_v23 = vpop.xlane.xlu0 %506 }
 0x266   : > { %v513_v13 = vadd.f32 %v512_v19, %v507_v23  ;;  %523 = vperm.xlu1 %865, %v514_v22   ;;  %v516_v24 = vmul.f32 %v514_v22, %v514_v22 }
 0x268   : > { %v515_v25 = vmul.f32 0.0009765625, %v513_v13 }
 0x26a   : > { %v517_v26 = vsub.f32 %v515_v25, %v516_v24 }
 0x26c   : > { %v518_v27 = vmax.f32 %v517_v26, 0.0 }
 0x26e   : > { %v519_v28 = vadd.f32 1e-05, %v518_v27 }
 0x270   : > { %871 = vrsqrt.f32 %v519_v28 }
 0x27a   : > { %v872_v29 = vpop.eup %871 }
 0x27b   : > { %536 = vperm.xlu0 %866, %v872_v29  }
 0x2e5   : > { %v524_v30 = vpop.permute.xlu1 %523 }
 0x2e6   : > { %v526_v31 = vsub.f32 %v1337_v41, %v524_v30  ;;  %v527_v32 = vsub.f32 %v1341_v43, %v524_v30  ;;  %v528_v14 = vsub.f32 %v1349_v47, %v524_v30  ;;  %v529_v33 = vsub.f32 %v463_v53, %v524_v30 }
 0x2e7   : > { %v530_v34 = vsub.f32 %v1339_v42, %v524_v30  ;;  %v531_v35 = vsub.f32 %v1343_v44, %v524_v30  ;;  %v532_v36 = vsub.f32 %v1351_v48, %v524_v30  ;;  %v533_v7 = vsub.f32 %v473_v54, %v524_v30 }
 0x2fa   : > { %v537_v37 = vpop.permute.xlu0 %536 }
 0x2fb   : > { %v539_v10 = vmul.f32 %v537_v37, %v526_v31  ;;  %v540_v38 = vmul.f32 %v537_v37, %v527_v32  ;;  %v541_v20 = vmul.f32 %v537_v37, %v528_v14  ;;  %v542_v39 = vmul.f32 %v537_v37, %v529_v33 }
 0x2fc   : > { %v543_v40 = vmul.f32 %v537_v37, %v530_v34  ;;  %v544_v6 = vmul.f32 %v537_v37, %v531_v35  ;;  %v545_v0 = vmul.f32 %v537_v37, %v532_v36  ;;  %v546_v15 = vmul.f32 %v537_v37, %v533_v7 }
 0x2fd   : > { %v547_v21 = vmax.f32 %v539_v10, 0.0  ;;  %v548_v41 = vmax.f32 %v540_v38, 0.0  ;;  %v549_v42 = vmax.f32 %v541_v20, 0.0  ;;  %v550_v43 = vmax.f32 %v542_v39, 0.0 }
 0x2fe   : > { %v551_v44 = vmax.f32 %v543_v40, 0.0  ;;  %v552_v45 = vmax.f32 %v544_v6, 0.0  ;;  %v553_v46 = vmax.f32 %v545_v0, 0.0  ;;  %v554_v47 = vmax.f32 %v546_v15, 0.0 }
 0x2ff   : > { %v724_v48 = vpack.c.bf16 %v548_v41, %v547_v21  ;;  %v725_v49 = vpack.c.bf16 %v550_v43, %v549_v42 }
 0x300   : > { %v726_v50 = vpack.c.bf16 %v552_v45, %v551_v44  ;;  %v727_v51 = vpack.c.bf16 %v554_v47, %v553_v46 }
 0x301   : > { %579 = vst [vmem:[%s196_s23] sm:$0xff] %v724_v48  ;;  %580 = vst [vmem:[%s196_s23 + $0x8] sm:$0xff] %v725_v49 }
 0x302   : > { %581 = vst [vmem:[%s196_s23 + $0x10] sm:$0xff] %v726_v50  ;;  %582 = vst [vmem:[%s196_s23 + $0x18] sm:$0xff] %v727_v51 }
 0x303   : > { %944 = shalt.err (!%p941_p5)
}
 0x304   : > { %s945_s5 = scalar_lea.hbm %s1378_s8, 512  ;;  %s949_s7 = scalar_lea.hbm %s1431_s2, 1024 }
 0x305   : > { %p946_p9 = scmp.ne.s32.totalorder %s1378_s8, %s945_s5  ;;  %p950_p7 = scmp.lt.u32.totalorder %s1378_s8, %s1431_s2 }
 0x306   : > { %p951_p3 = scmp.lt.u32.totalorder %s949_s7, %s945_s5  ;;  %p953_p13 = scmp.lt.u32.totalorder %s945_s5, %s1378_s8 }
 0x307   : > { %p947_p1 = pnand %p946_p9, %p1146_p10 }
 0x308   : > { %p952_p4 = por %p951_p3, %p950_p7 }
 0x309   : > { %p948_p2 = pneg %p947_p1 }
 0x30a   : > { %p954_p6 = por %p953_p13, %p952_p4 }
 0x30c   : > { %p955_p8 = pnand %p954_p6, %p948_p2 }
 0x30e   : > { %958 = shalt.err (!%p955_p8)
}
 0x30f   : > { %s1033_s22 = smov 128   ;;  %s1034_s27 = smov 8  }
 0x310   : > { %745 = dma.vmem_to_hbm [thread:$0]  (%p1146_p10), %s1380_s29, 512, %s1378_s8, %s584_s12, %s1033_s22, %s1033_s22, %s1034_s27  }
 0x311 PF: > { %s614_s23 = sand.u32 1, %s997_s9   ;;  %p1457_p12 = scmp.ne.s32.totalorder %s1439_s20, 0 }
 0x312   : > { %p1458_p11 = scmp.ge.s32.totalorder %s1017_s14, 2  ;;  %s615_s30 = scalar_lea.sflag [#allocation4], %s614_s23 }
 0x314   : > { %p756_p0 = pnand %p1458_p11, %p1457_p12 }
 0x316   : > { %992 = dma.done.wait (!%p756_p0), %s615_s30, 512  }
 0x317   : > { %994 = vsyncadd (!%p756_p0), %s615_s30, 4294966784  ;;  %s19_s14 = sadd.s32 1, %s1017_s14   ;;  %s1459_s9 = smov %s1001_s10 }
 0x318   : > { %p16_p5 = scmp.ge.s32.totalorder %s19_s14, 4   ;;  %s1460_s10 = smov %s1005_s11 }
 0x319   : > { %s1461_s11 = smov %s1155_s28  ;;  %s1462_s12 = smov %s1013_s13 }
 0x31a   : > { %s1463_s13 = smov %s1465_s25  ;;  %18 = sbr.rel (!%p16_p5) target bundleno = 7 (0x7), region = 78 }
 0x321   :  { %620 = vsyncpa [#allocation3], 1 }
 0x322   :  { %622 = vsyncpa [#allocation3 + $0x1], 1 }
 0x323   :  { %623 = vsyncpa [#allocation6], 1 }
 0x324   :  { %624 = vsyncpa [#allocation4], 1 }
 0x325   :  { %626 = vsyncpa [#allocation4 + $0x1], 1 }

</bundles_post_ra>
